<compile_context>
chip_gen: v5e
topology: v5e:2x2
jax: 0.10.0
libtpu: 0.0.40
codegen_flags: <defaults>
</compile_context>

<pallas_src>
import jax
import jax.numpy as jnp
from jax.experimental import pallas as pl
from jax.experimental.pallas import tpu as pltpu

F_IN = 4     # node_features == conv_out_channels
F_CONV = 4   # GatedGraphConv out_channels
H_LSTM = 32  # LSTM hidden size


def _recurrent_gcn_kernel(
    adj_ref,      # (TM, N)  bf16  row-normalized adjacency (dst rows, src cols)
    xsrc_ref,     # (N, 4)   bf16  all node features (message sources, resident)
    x_ref,        # (TM, 4)  f32   node features for this row block (GRU hidden)
    h0_ref,       # (TM, 32) f32
    c0_ref,       # (TM, 32) f32
    ggc_w_ref,    # (4, 4)   f32
    gru_w_ref,    # (8, 24)  f32   block-diagonal [Wi ; Wh] -> [gi | gh]
    gru_b_ref,    # (1, 24)  f32   [bi | bh]
    lstm_w_ref,   # (36,128) f32   stacked [Wi ; Wh]
    lstm_b_ref,   # (1, 128) f32   bi + bh
    lin_w_ref,    # (32, 1)  f32
    lin_b_ref,    # (1, 1)   f32
    out_ref,      # (TM, 65) f32   [h1 | c1 | y]
):
    f = F_CONV
    hh = H_LSTM

    x = x_ref[...]                                                    # (TM, 4)

    # ---- GatedGraphConv, 1 layer, aggr='mean':  agg = (A_norm @ X) @ W  (assoc. with A @ (X W))
    ax = jnp.dot(adj_ref[...], xsrc_ref[...],
                 preferred_element_type=jnp.float32)                  # (TM, 4)
    agg = jnp.dot(ax, ggc_w_ref[...],
                  preferred_element_type=jnp.float32)                 # (TM, 4)

    # ---- GRUCell(input=agg, hidden=x); PyTorch gate order [r, z, n]; fused single dot
    gru_in = jnp.concatenate([agg, x], axis=1)                        # (TM, 8)
    g = jnp.dot(gru_in, gru_w_ref[...],
                preferred_element_type=jnp.float32) + gru_b_ref[...]  # (TM, 24) = [gi | gh]
    gi = g[:, 0:3 * f]
    gh = g[:, 3 * f:6 * f]
    r = jax.nn.sigmoid(gi[:, 0:f] + gh[:, 0:f])
    z = jax.nn.sigmoid(gi[:, f:2 * f] + gh[:, f:2 * f])
    n = jnp.tanh(gi[:, 2 * f:3 * f] + r * gh[:, 2 * f:3 * f])
    h_tilde = (1.0 - z) * n + z * x                                   # (TM, 4)

    # ---- LSTM, 1 layer, seq_len=1; gate order [i, f, g, o]; fused single dot
    lstm_in = jnp.concatenate([h_tilde, h0_ref[...]], axis=1)         # (TM, 36)
    gates = jnp.dot(lstm_in, lstm_w_ref[...],
                    preferred_element_type=jnp.float32) + lstm_b_ref[...]   # (TM, 128)
    i_g = jax.nn.sigmoid(gates[:, 0:hh])
    f_g = jax.nn.sigmoid(gates[:, hh:2 * hh])
    g_g = jnp.tanh(gates[:, 2 * hh:3 * hh])
    o_g = jax.nn.sigmoid(gates[:, 3 * hh:4 * hh])
    c1 = f_g * c0_ref[...] + i_g * g_g
    h1 = o_g * jnp.tanh(c1)                                           # (TM, 32)

    # ---- ReLU + Linear(32 -> 1)
    hr = jnp.maximum(h1, 0.0)
    y = jnp.dot(hr, lin_w_ref[...],
                preferred_element_type=jnp.float32) + lin_b_ref[...]  # (TM, 1)

    # Single lane-dense output slab: [h1 | c1 | y]
    out_ref[...] = jnp.concatenate([h1, c1, y], axis=1)


def _row_tile(n):
    """Row-tile size: full rows for small graphs, else keep the double-buffered
    bf16 (TM, N) adjacency strip comfortably inside v7x's 64 MiB VMEM."""
    if n <= 256:
        return n
    tm = 256
    while tm > 8 and tm * n * 2 > 12 * 1024 * 1024:   # <= ~12 MiB per pipeline buffer
        tm //= 2
    return max(tm, 8)


def recurrent_gcn_forward(params, x, edge_index, edge_weight, h0, c0):
    """x: (N, 4); edge_index: (2, E) int32; edge_weight: (E,); h0/c0: (N, 32)."""
    n = x.shape[0]
    f = F_CONV
    hh = H_LSTM

    src = edge_index[0]
    dst = edge_index[1]

    # Glue: dense adjacency adj[dst, src] = w, row-normalized by in-edge COUNT
    # (PyG GatedGraphConv aggr='mean' semantics), then cast to bf16 for the big matmul.
    adj = jnp.zeros((n, n), jnp.float32).at[dst, src].add(edge_weight.astype(jnp.float32))
    deg = jnp.zeros((n,), jnp.float32).at[dst].add(1.0)
    adj_norm = (adj * (1.0 / jnp.maximum(deg, 1.0))[:, None]).astype(jnp.bfloat16)

    x_f32 = x.astype(jnp.float32)
    x_src = x_f32.astype(jnp.bfloat16)
    h0 = h0.astype(jnp.float32)
    c0 = c0.astype(jnp.float32)

    # Fuse the tiny per-gate matmuls into single MXU ops (glue-side packing).
    gru_w = jnp.zeros((2 * f, 6 * f), jnp.float32)
    gru_w = gru_w.at[0:f, 0:3 * f].set(params["gru_wi"])
    gru_w = gru_w.at[f:2 * f, 3 * f:6 * f].set(params["gru_wh"])
    gru_b = jnp.concatenate([params["gru_bi"], params["gru_bh"]], axis=1)     # (1, 24)
    lstm_w = jnp.concatenate([params["lstm_wi"], params["lstm_wh"]], axis=0)  # (36, 128)
    lstm_b = params["lstm_bi"] + params["lstm_bh"]                            # (1, 128)

    tm = _row_tile(n)
    grid = (pl.cdiv(n, tm),)
    out_w = 2 * hh + 1

    # Explicit VMEM budget (double-buffered tiles + params + headroom).
    per_buf = tm * n * 2 + tm * (f + 2 * hh + out_w) * 4
    vmem_limit = int(min(max(2 * per_buf + (4 << 20), 16 << 20), 48 << 20))

    row = lambda i: (i, 0)   # tiled over node rows
    rep = lambda i: (0, 0)   # resident (same block every grid step -> no re-DMA)

    out = pl.pallas_call(
        _recurrent_gcn_kernel,
        out_shape=jax.ShapeDtypeStruct((n, out_w), jnp.float32),
        grid=grid,
        in_specs=[
            pl.BlockSpec((tm, n), row),            # adj_norm row strip (bf16)
            pl.BlockSpec((n, f), rep),             # x_src (bf16, resident)
            pl.BlockSpec((tm, f), row),            # x rows (f32, GRU hidden)
            pl.BlockSpec((tm, hh), row),           # h0
            pl.BlockSpec((tm, hh), row),           # c0
            pl.BlockSpec((f, f), rep),             # ggc_w
            pl.BlockSpec((2 * f, 6 * f), rep),     # gru_w (block diagonal)
            pl.BlockSpec((1, 6 * f), rep),         # gru_b
            pl.BlockSpec((f + hh, 4 * hh), rep),   # lstm_w (stacked)
            pl.BlockSpec((1, 4 * hh), rep),        # lstm_b (bi + bh)
            pl.BlockSpec((hh, 1), rep),            # lin_w
            pl.BlockSpec((1, 1), rep),             # lin_b
        ],
        out_specs=pl.BlockSpec((tm, out_w), row),
        compiler_params=pltpu.CompilerParams(
            dimension_semantics=("parallel",),
            vmem_limit_bytes=vmem_limit,
        ),
    )(adj_norm, x_src, x_f32, h0, c0,
      params["ggc_w"], gru_w, gru_b, lstm_w, lstm_b,
      params["lin_w"], params["lin_b"])

    h1 = out[:, 0:hh]
    c1 = out[:, hh:2 * hh]
    y = out[:, 2 * hh:2 * hh + 1]
    return y, h1, c1


def init_params(key):
    ks = jax.random.split(key, 12)
    s = 0.1
    return {
        # GatedGraphConv: weight[num_layers=1] -> (4, 4)
        "ggc_w": s * jax.random.normal(ks[0], (F_CONV, F_CONV), jnp.float32),
        # GRUCell(4, 4): stored transposed, gate order [r, z, n]
        "gru_wi": s * jax.random.normal(ks[1], (F_CONV, 3 * F_CONV), jnp.float32),
        "gru_wh": s * jax.random.normal(ks[2], (F_CONV, 3 * F_CONV), jnp.float32),
        "gru_bi": s * jax.random.normal(ks[3], (1, 3 * F_CONV), jnp.float32),
        "gru_bh": s * jax.random.normal(ks[4], (1, 3 * F_CONV), jnp.float32),
        # LSTM(4 -> 32): stored transposed, gate order [i, f, g, o]
        "lstm_wi": s * jax.random.normal(ks[5], (F_CONV, 4 * H_LSTM), jnp.float32),
        "lstm_wh": s * jax.random.normal(ks[6], (H_LSTM, 4 * H_LSTM), jnp.float32),
        "lstm_bi": s * jax.random.normal(ks[7], (1, 4 * H_LSTM), jnp.float32),
        "lstm_bh": s * jax.random.normal(ks[8], (1, 4 * H_LSTM), jnp.float32),
        # Linear(32 -> 1): stored transposed
        "lin_w": s * jax.random.normal(ks[9], (H_LSTM, 1), jnp.float32),
        "lin_b": s * jax.random.normal(ks[10], (1, 1), jnp.float32),
    }


def _reference(params, x, edge_index, edge_weight, h0, c0):
    """Pure-JAX f32 reference with the original (unfused) math."""
    n = x.shape[0]
    f = F_CONV
    hh = H_LSTM
    src, dst = edge_index[0], edge_index[1]
    adj = jnp.zeros((n, n), jnp.float32).at[dst, src].add(edge_weight.astype(jnp.float32))
    deg = jnp.zeros((n, 1), jnp.float32).at[dst, 0].add(1.0)
    m = x @ params["ggc_w"]
    agg = (adj @ m) / jnp.maximum(deg, 1.0)
    gi = agg @ params["gru_wi"] + params["gru_bi"]
    gh = x @ params["gru_wh"] + params["gru_bh"]
    r = jax.nn.sigmoid(gi[:, :f] + gh[:, :f])
    z = jax.nn.sigmoid(gi[:, f:2 * f] + gh[:, f:2 * f])
    nn_ = jnp.tanh(gi[:, 2 * f:] + r * gh[:, 2 * f:])
    h_tilde = (1.0 - z) * nn_ + z * x
    gates = (h_tilde @ params["lstm_wi"] + params["lstm_bi"]
             + h0 @ params["lstm_wh"] + params["lstm_bh"])
    i_g = jax.nn.sigmoid(gates[:, :hh])
    f_g = jax.nn.sigmoid(gates[:, hh:2 * hh])
    g_g = jnp.tanh(gates[:, 2 * hh:3 * hh])
    o_g = jax.nn.sigmoid(gates[:, 3 * hh:])
    c1 = f_g * c0 + i_g * g_g
    h1 = o_g * jnp.tanh(c1)
    y = jnp.maximum(h1, 0.0) @ params["lin_w"] + params["lin_b"]
    return y, h1, c1


if __name__ == "__main__":
    key = jax.random.PRNGKey(0)
    k_p, k_x, k_ei, k_ew, k_h, k_c = jax.random.split(key, 6)

    N, E = 16, 40
    params = init_params(k_p)
    x = jax.random.normal(k_x, (N, F_IN), jnp.float32)
    edge_index = jax.random.randint(k_ei, (2, E), 0, N, dtype=jnp.int32)
    edge_weight = jax.random.uniform(k_ew, (E,), jnp.float32)
    h0 = jax.random.normal(k_h, (N, H_LSTM), jnp.float32)
    c0 = jax.random.normal(k_c, (N, H_LSTM), jnp.float32)

    y, h_new, c_new = jax.jit(recurrent_gcn_forward)(params, x, edge_index, edge_weight, h0, c0)
    jax.block_until_ready((y, h_new, c_new))
    assert y.shape == (N, 1) and h_new.shape == (N, H_LSTM) and c_new.shape == (N, H_LSTM)

    # Loose tolerance: kernel uses a bf16 adjacency/feature matmul (f32 accumulation).
    y_r, h_r, c_r = _reference(params, x, edge_index, edge_weight, h0, c0)
    assert float(jnp.max(jnp.abs(y - y_r))) < 5e-2
    assert float(jnp.max(jnp.abs(h_new - h_r))) < 5e-2
    assert float(jnp.max(jnp.abs(c_new - c_r))) < 5e-2

    print("KERNEL_OK")
</pallas_src>

<mosaic_0001>
module attributes {stable_mosaic.version = 11 : i64} {
  func.func @_recurrent_gcn_kernel(%arg0: i32, %arg1: memref<16x16xbf16, #tpu.memory_space<vmem>>, %arg2: memref<16x4xbf16, #tpu.memory_space<vmem>>, %arg3: memref<16x4xf32, #tpu.memory_space<vmem>>, %arg4: memref<16x32xf32, #tpu.memory_space<vmem>>, %arg5: memref<16x32xf32, #tpu.memory_space<vmem>>, %arg6: memref<4x4xf32, #tpu.memory_space<vmem>>, %arg7: memref<8x24xf32, #tpu.memory_space<vmem>>, %arg8: memref<1x24xf32, #tpu.memory_space<vmem>>, %arg9: memref<36x128xf32, #tpu.memory_space<vmem>>, %arg10: memref<1x128xf32, #tpu.memory_space<vmem>>, %arg11: memref<32x1xf32, #tpu.memory_space<vmem>>, %arg12: memref<1x1xf32, #tpu.memory_space<vmem>>, %arg13: memref<16x65xf32, #tpu.memory_space<vmem>>) attributes {dimension_semantics = [#tpu.dimension_semantics<parallel>], iteration_bounds = array<i64: 1>, scalar_prefetch = 0 : i64, scratch_operands = 0 : i64, tpu.core_type = #tpu.core_type<tc>, window_params = [{transform_indices = @transform_0, window_bounds = array<i64: 16, 16>}, {pipeline_mode = #tpu.pipeline_mode<synchronous>, transform_indices = @transform_1, window_bounds = array<i64: 16, 4>}, {transform_indices = @transform_2, window_bounds = array<i64: 16, 4>}, {transform_indices = @transform_3, window_bounds = array<i64: 16, 32>}, {transform_indices = @transform_4, window_bounds = array<i64: 16, 32>}, {pipeline_mode = #tpu.pipeline_mode<synchronous>, transform_indices = @transform_5, window_bounds = array<i64: 4, 4>}, {pipeline_mode = #tpu.pipeline_mode<synchronous>, transform_indices = @transform_6, window_bounds = array<i64: 8, 24>}, {pipeline_mode = #tpu.pipeline_mode<synchronous>, transform_indices = @transform_7, window_bounds = array<i64: 1, 24>}, {pipeline_mode = #tpu.pipeline_mode<synchronous>, transform_indices = @transform_8, window_bounds = array<i64: 36, 128>}, {pipeline_mode = #tpu.pipeline_mode<synchronous>, transform_indices = @transform_9, window_bounds = array<i64: 1, 128>}, {pipeline_mode = #tpu.pipeline_mode<synchronous>, transform_indices = @transform_10, window_bounds = array<i64: 32, 1>}, {pipeline_mode = #tpu.pipeline_mode<synchronous>, transform_indices = @transform_11, window_bounds = array<i64: 1, 1>}, {transform_indices = @transform_12, window_bounds = array<i64: 16, 65>}]} {
    %c0 = arith.constant 0 : index
    %c0_0 = arith.constant 0 : index
    %0 = vector.load %arg3[%c0, %c0_0] : memref<16x4xf32, #tpu.memory_space<vmem>>, vector<16x4xf32>
    %c0_1 = arith.constant 0 : index
    %c0_2 = arith.constant 0 : index
    %1 = vector.load %arg1[%c0_1, %c0_2] : memref<16x16xbf16, #tpu.memory_space<vmem>>, vector<16x16xbf16>
    %c0_3 = arith.constant 0 : index
    %c0_4 = arith.constant 0 : index
    %2 = vector.load %arg2[%c0_3, %c0_4] : memref<16x4xbf16, #tpu.memory_space<vmem>>, vector<16x4xbf16>
    %cst = arith.constant dense<0.000000e+00> : vector<16x4xf32>
    %3 = tpu.matmul %1, %2, %cst {dimension_numbers = #tpu.dot_dimension_numbers<[1], [0], [0], [1], [0, 0, 1, 1], [], []>} : vector<16x16xbf16>, vector<16x4xbf16>, vector<16x4xf32> -> vector<16x4xf32>
    %c0_5 = arith.constant 0 : index
    %c0_6 = arith.constant 0 : index
    %4 = vector.load %arg6[%c0_5, %c0_6] : memref<4x4xf32, #tpu.memory_space<vmem>>, vector<4x4xf32>
    %cst_7 = arith.constant dense<0.000000e+00> : vector<16x4xf32>
    %5 = tpu.matmul %3, %4, %cst_7 {dimension_numbers = #tpu.dot_dimension_numbers<[1], [0], [0], [1], [0, 0, 1, 1], [], []>} : vector<16x4xf32>, vector<4x4xf32>, vector<16x4xf32> -> vector<16x4xf32>
    %6 = tpu.concatenate %5, %0 in 1 : vector<16x4xf32>, vector<16x4xf32> -> vector<16x8xf32>
    %c0_8 = arith.constant 0 : index
    %c0_9 = arith.constant 0 : index
    %7 = vector.load %arg7[%c0_8, %c0_9] : memref<8x24xf32, #tpu.memory_space<vmem>>, vector<8x24xf32>
    %cst_10 = arith.constant dense<0.000000e+00> : vector<16x24xf32>
    %8 = tpu.matmul %6, %7, %cst_10 {dimension_numbers = #tpu.dot_dimension_numbers<[1], [0], [0], [1], [0, 0, 1, 1], [], []>} : vector<16x8xf32>, vector<8x24xf32>, vector<16x24xf32> -> vector<16x24xf32>
    %c0_11 = arith.constant 0 : index
    %c0_12 = arith.constant 0 : index
    %9 = vector.load %arg8[%c0_11, %c0_12] : memref<1x24xf32, #tpu.memory_space<vmem>>, vector<1x24xf32>
    %10 = vector.broadcast %9 : vector<1x24xf32> to vector<16x24xf32>
    %11 = arith.addf %8, %10 : vector<16x24xf32>
    %12 = vector.extract_strided_slice %11 {offsets = [0, 0], sizes = [16, 12], strides = [1, 1]} : vector<16x24xf32> to vector<16x12xf32>
    %13 = vector.extract_strided_slice %11 {offsets = [0, 12], sizes = [16, 12], strides = [1, 1]} : vector<16x24xf32> to vector<16x12xf32>
    %14 = vector.extract_strided_slice %12 {offsets = [0, 0], sizes = [16, 4], strides = [1, 1]} : vector<16x12xf32> to vector<16x4xf32>
    %15 = vector.extract_strided_slice %13 {offsets = [0, 0], sizes = [16, 4], strides = [1, 1]} : vector<16x12xf32> to vector<16x4xf32>
    %16 = arith.addf %14, %15 : vector<16x4xf32>
    %17 = arith.negf %16 : vector<16x4xf32>
    %18 = math.exp %17 : vector<16x4xf32>
    %cst_13 = arith.constant 1.000000e+00 : f32
    %19 = vector.broadcast %cst_13 : f32 to vector<16x4xf32>
    %20 = arith.addf %19, %18 : vector<16x4xf32>
    %21 = arith.divf %19, %20 : vector<16x4xf32>
    %22 = vector.extract_strided_slice %12 {offsets = [0, 4], sizes = [16, 4], strides = [1, 1]} : vector<16x12xf32> to vector<16x4xf32>
    %23 = vector.extract_strided_slice %13 {offsets = [0, 4], sizes = [16, 4], strides = [1, 1]} : vector<16x12xf32> to vector<16x4xf32>
    %24 = arith.addf %22, %23 : vector<16x4xf32>
    %25 = arith.negf %24 : vector<16x4xf32>
    %26 = math.exp %25 : vector<16x4xf32>
    %cst_14 = arith.constant 1.000000e+00 : f32
    %27 = vector.broadcast %cst_14 : f32 to vector<16x4xf32>
    %28 = arith.addf %27, %26 : vector<16x4xf32>
    %29 = arith.divf %27, %28 : vector<16x4xf32>
    %30 = vector.extract_strided_slice %12 {offsets = [0, 8], sizes = [16, 4], strides = [1, 1]} : vector<16x12xf32> to vector<16x4xf32>
    %31 = vector.extract_strided_slice %13 {offsets = [0, 8], sizes = [16, 4], strides = [1, 1]} : vector<16x12xf32> to vector<16x4xf32>
    %32 = arith.mulf %21, %31 : vector<16x4xf32>
    %33 = arith.addf %30, %32 : vector<16x4xf32>
    %34 = math.tanh %33 : vector<16x4xf32>
    %cst_15 = arith.constant 1.000000e+00 : f32
    %35 = vector.broadcast %cst_15 : f32 to vector<16x4xf32>
    %36 = arith.subf %35, %29 : vector<16x4xf32>
    %37 = arith.mulf %36, %34 : vector<16x4xf32>
    %38 = arith.mulf %29, %0 : vector<16x4xf32>
    %39 = arith.addf %37, %38 : vector<16x4xf32>
    %c0_16 = arith.constant 0 : index
    %c0_17 = arith.constant 0 : index
    %40 = vector.load %arg4[%c0_16, %c0_17] : memref<16x32xf32, #tpu.memory_space<vmem>>, vector<16x32xf32>
    %41 = tpu.concatenate %39, %40 in 1 : vector<16x4xf32>, vector<16x32xf32> -> vector<16x36xf32>
    %c0_18 = arith.constant 0 : index
    %c0_19 = arith.constant 0 : index
    %42 = vector.load %arg9[%c0_18, %c0_19] : memref<36x128xf32, #tpu.memory_space<vmem>>, vector<36x128xf32>
    %cst_20 = arith.constant dense<0.000000e+00> : vector<16x128xf32>
    %43 = tpu.matmul %41, %42, %cst_20 {dimension_numbers = #tpu.dot_dimension_numbers<[1], [0], [0], [1], [0, 0, 1, 1], [], []>} : vector<16x36xf32>, vector<36x128xf32>, vector<16x128xf32> -> vector<16x128xf32>
    %c0_21 = arith.constant 0 : index
    %c0_22 = arith.constant 0 : index
    %44 = vector.load %arg10[%c0_21, %c0_22] : memref<1x128xf32, #tpu.memory_space<vmem>>, vector<1x128xf32>
    %45 = vector.broadcast %44 : vector<1x128xf32> to vector<16x128xf32>
    %46 = arith.addf %43, %45 : vector<16x128xf32>
    %47 = vector.extract_strided_slice %46 {offsets = [0, 0], sizes = [16, 32], strides = [1, 1]} : vector<16x128xf32> to vector<16x32xf32>
    %48 = arith.negf %47 : vector<16x32xf32>
    %49 = math.exp %48 : vector<16x32xf32>
    %cst_23 = arith.constant 1.000000e+00 : f32
    %50 = vector.broadcast %cst_23 : f32 to vector<16x32xf32>
    %51 = arith.addf %50, %49 : vector<16x32xf32>
    %52 = arith.divf %50, %51 : vector<16x32xf32>
    %53 = vector.extract_strided_slice %46 {offsets = [0, 32], sizes = [16, 32], strides = [1, 1]} : vector<16x128xf32> to vector<16x32xf32>
    %54 = arith.negf %53 : vector<16x32xf32>
    %55 = math.exp %54 : vector<16x32xf32>
    %cst_24 = arith.constant 1.000000e+00 : f32
    %56 = vector.broadcast %cst_24 : f32 to vector<16x32xf32>
    %57 = arith.addf %56, %55 : vector<16x32xf32>
    %58 = arith.divf %56, %57 : vector<16x32xf32>
    %59 = vector.extract_strided_slice %46 {offsets = [0, 64], sizes = [16, 32], strides = [1, 1]} : vector<16x128xf32> to vector<16x32xf32>
    %60 = math.tanh %59 : vector<16x32xf32>
    %61 = vector.extract_strided_slice %46 {offsets = [0, 96], sizes = [16, 32], strides = [1, 1]} : vector<16x128xf32> to vector<16x32xf32>
    %62 = arith.negf %61 : vector<16x32xf32>
    %63 = math.exp %62 : vector<16x32xf32>
    %cst_25 = arith.constant 1.000000e+00 : f32
    %64 = vector.broadcast %cst_25 : f32 to vector<16x32xf32>
    %65 = arith.addf %64, %63 : vector<16x32xf32>
    %66 = arith.divf %64, %65 : vector<16x32xf32>
    %c0_26 = arith.constant 0 : index
    %c0_27 = arith.constant 0 : index
    %67 = vector.load %arg5[%c0_26, %c0_27] : memref<16x32xf32, #tpu.memory_space<vmem>>, vector<16x32xf32>
    %68 = arith.mulf %58, %67 : vector<16x32xf32>
    %69 = arith.mulf %52, %60 : vector<16x32xf32>
    %70 = arith.addf %68, %69 : vector<16x32xf32>
    %71 = math.tanh %70 : vector<16x32xf32>
    %72 = arith.mulf %66, %71 : vector<16x32xf32>
    %cst_28 = arith.constant 0.000000e+00 : f32
    %73 = vector.broadcast %cst_28 : f32 to vector<16x32xf32>
    %74 = arith.maximumf %72, %73 : vector<16x32xf32>
    %c0_29 = arith.constant 0 : index
    %c0_30 = arith.constant 0 : index
    %75 = vector.load %arg11[%c0_29, %c0_30] : memref<32x1xf32, #tpu.memory_space<vmem>>, vector<32x1xf32>
    %cst_31 = arith.constant dense<0.000000e+00> : vector<16x1xf32>
    %76 = tpu.matmul %74, %75, %cst_31 {dimension_numbers = #tpu.dot_dimension_numbers<[1], [0], [0], [1], [0, 0, 1, 1], [], []>} : vector<16x32xf32>, vector<32x1xf32>, vector<16x1xf32> -> vector<16x1xf32>
    %c0_32 = arith.constant 0 : index
    %c0_33 = arith.constant 0 : index
    %77 = vector.load %arg12[%c0_32, %c0_33] : memref<1x1xf32, #tpu.memory_space<vmem>>, vector<1x1xf32>
    %78 = vector.broadcast %77 : vector<1x1xf32> to vector<16x1xf32>
    %79 = arith.addf %76, %78 : vector<16x1xf32>
    %80 = tpu.concatenate %72, %70, %79 in 1 : vector<16x32xf32>, vector<16x32xf32>, vector<16x1xf32> -> vector<16x65xf32>
    %c0_34 = arith.constant 0 : index
    %c0_35 = arith.constant 0 : index
    %81 = vector.load %arg13[%c0_34, %c0_35] : memref<16x65xf32, #tpu.memory_space<vmem>>, vector<16x65xf32>
    tpu.vector_store %arg13[%c0_34, %c0_35], %80 {strides = array<i32>} : memref<16x65xf32, #tpu.memory_space<vmem>>, vector<16x65xf32>,
    return
  }
  func.func @transform_0(%arg0: i32) -> (i32, i32) {
    %c0_i32 = arith.constant 0 : i32
    %c0_i32_0 = arith.constant 0 : i32
    return %arg0, %c0_i32 : i32, i32
  }
  func.func @transform_1(%arg0: i32) -> (i32, i32) {
    %c0_i32 = arith.constant 0 : i32
    %c0_i32_0 = arith.constant 0 : i32
    %c0_i32_1 = arith.constant 0 : i32
    return %c0_i32, %c0_i32_0 : i32, i32
  }
  func.func @transform_2(%arg0: i32) -> (i32, i32) {
    %c0_i32 = arith.constant 0 : i32
    %c0_i32_0 = arith.constant 0 : i32
    return %arg0, %c0_i32 : i32, i32
  }
  func.func @transform_3(%arg0: i32) -> (i32, i32) {
    %c0_i32 = arith.constant 0 : i32
    %c0_i32_0 = arith.constant 0 : i32
    return %arg0, %c0_i32 : i32, i32
  }
  func.func @transform_4(%arg0: i32) -> (i32, i32) {
    %c0_i32 = arith.constant 0 : i32
    %c0_i32_0 = arith.constant 0 : i32
    return %arg0, %c0_i32 : i32, i32
  }
  func.func @transform_5(%arg0: i32) -> (i32, i32) {
    %c0_i32 = arith.constant 0 : i32
    %c0_i32_0 = arith.constant 0 : i32
    %c0_i32_1 = arith.constant 0 : i32
    return %c0_i32, %c0_i32_0 : i32, i32
  }
  func.func @transform_6(%arg0: i32) -> (i32, i32) {
    %c0_i32 = arith.constant 0 : i32
    %c0_i32_0 = arith.constant 0 : i32
    %c0_i32_1 = arith.constant 0 : i32
    return %c0_i32, %c0_i32_0 : i32, i32
  }
  func.func @transform_7(%arg0: i32) -> (i32, i32) {
    %c0_i32 = arith.constant 0 : i32
    %c0_i32_0 = arith.constant 0 : i32
    %c0_i32_1 = arith.constant 0 : i32
    return %c0_i32, %c0_i32_0 : i32, i32
  }
  func.func @transform_8(%arg0: i32) -> (i32, i32) {
    %c0_i32 = arith.constant 0 : i32
    %c0_i32_0 = arith.constant 0 : i32
    %c0_i32_1 = arith.constant 0 : i32
    return %c0_i32, %c0_i32_0 : i32, i32
  }
  func.func @transform_9(%arg0: i32) -> (i32, i32) {
    %c0_i32 = arith.constant 0 : i32
    %c0_i32_0 = arith.constant 0 : i32
    %c0_i32_1 = arith.constant 0 : i32
    return %c0_i32, %c0_i32_0 : i32, i32
  }
  func.func @transform_10(%arg0: i32) -> (i32, i32) {
    %c0_i32 = arith.constant 0 : i32
    %c0_i32_0 = arith.constant 0 : i32
    %c0_i32_1 = arith.constant 0 : i32
    return %c0_i32, %c0_i32_0 : i32, i32
  }
  func.func @transform_11(%arg0: i32) -> (i32, i32) {
    %c0_i32 = arith.constant 0 : i32
    %c0_i32_0 = arith.constant 0 : i32
    %c0_i32_1 = arith.constant 0 : i32
    return %c0_i32, %c0_i32_0 : i32, i32
  }
  func.func @transform_12(%arg0: i32) -> (i32, i32) {
    %c0_i32 = arith.constant 0 : i32
    %c0_i32_0 = arith.constant 0 : i32
    return %arg0, %c0_i32 : i32, i32
  }
}

</mosaic_0001>

<bundles_post_ra>
// kernel: recurrent_gcn_forward.1
= control target key start
LH: loop header
LB: loop body
LE: loop exit
PB: predicated region body
PF: predicated region fallthrough
CT: control target
= control target key end

     0   :  { %vm61_vm0 = vcmask 130048   ;;  %vm87_vm1 = vcmask 1043456   ;;  %vm80_vm2 = vcmask 31744   ;;  %vm129_vm3 = vcmask 64512   ;;  %s527_s14 = smov 116   ;;  %s529_s15 = smov 124   ;;  %s712_s1 = inlined_call_operand.vmem [shape: bf16[16,4], index: 1, kind: input, shape index: {}]   ;;  %s713_s0 = inlined_call_operand.vmem [shape: bf16[16,16], index: 0, kind: input, shape index: {}]   ;;  %s714_s5 = inlined_call_operand.vmem [shape: f32[4,4], index: 5, kind: input, shape index: {}]   ;;  %s715_s2 = inlined_call_operand.vmem [shape: f32[16,4], index: 2, kind: input, shape index: {}]   ;;  %s716_s6 = inlined_call_operand.vmem [shape: f32[8,24], index: 6, kind: input, shape index: {}]   ;;  %s717_s7 = inlined_call_operand.vmem [shape: f32[1,24], index: 7, kind: input, shape index: {}]   ;;  %s718_s3 = inlined_call_operand.vmem [shape: f32[16,32], index: 3, kind: input, shape index: {}]   ;;  %s719_s8 = inlined_call_operand.vmem [shape: f32[36,128], index: 8, kind: input, shape index: {}]   ;;  %s720_s9 = inlined_call_operand.vmem [shape: f32[1,128], index: 9, kind: input, shape index: {}]   ;;  %s721_s4 = inlined_call_operand.vmem [shape: f32[16,32], index: 4, kind: input, shape index: {}]   ;;  %s722_s10 = inlined_call_operand.vmem [shape: f32[32,1], index: 10, kind: input, shape index: {}]   ;;  %s723_s11 = inlined_call_operand.<no memory space> [shape: f32[1,1], index: 11, kind: input, shape index: {}]   ;;  %s724_s12 = inlined_call_operand.vmem [shape: f32[16,65], index: 12, kind: output, shape index: {}]  }
   0x1   :  { %v485_v0 = vld [vmem:[%s712_s1] sm:$0xff]  ;;  %v45_v5 = vld [vmem:[%s715_s2 + $0x8] sm:$0xff]  ;;  %vm272_vm12 = vcmask 293888   ;;  %s531_s13 = smov 64  }
   0x2   :  { %v484_v1 = vld [vmem:[%s713_s0] sm:$0xff]  ;;  %72 = vmatpush.bf16.msra.mxu0 %v485_v0  ;;  %s525_s0 = smov 4  }
   0x3   :  { %v79_v2 = vld [vmem:[%s714_s5] sm:$0xf] }
   0x4   :  { %470 = vmatpush.msk.msra.mxu1 %vm87_vm1, %v79_v2  ;;  %486 = vmatpush.msk.msra.mxu2 %vm87_vm1, %v79_v2  ;;  %v44_v3 = vld [vmem:[%s715_s2] sm:$0xff] }
   0x5   :  { %469 = vmatmul.msk.bf16.vlgmr.msra.gmra.mxu0 %vm61_vm0, %v484_v1  ;;  %v124_v4 = vld [vmem:[%s716_s6] sm:$0xff]  ;;  %116 = vrot.lane.b32.xlu0 %v44_v3, %s525_s0  ;;  %s526_s6 = smov 108   ;;  %v244_v1 = vld [vmem:[%s718_s3 + $0x8] sm:$0xff]  ;;  %v266_v3 = vld [vmem:[%s719_s8 + $0x18] sm:$0xff] }
   0x6   :  { %151 = vmatpush.msrb.mxu2 %v124_v4  ;;  %v494_v14 = vld [vmem:[%s717_s7] ss:$0 sm:$0xff]  ;;  %s528_s7 = smov 8   ;;  %v265_v4 = vld [vmem:[%s719_s8 + $0x10] sm:$0xff] }
   0x7   :  { %v243_v59 = vld [vmem:[%s718_s3] sm:$0xff] }
   0x8   :  { %v267_v2 = vld [vmem:[%s719_s8 + $0x20] sm:$0xf] }
   0x9   :  { %477 = vmatpush.msk.msra.mxu3 %vm87_vm1, %v267_v2 }
   0xb   :  { %294 = vmatpush.msra.mxu3 %v266_v3 }
   0xd   :  { %118 = vrot.lane.b32.xlu0 %v45_v5, %s525_s0  ;;  %v264_v5 = vld [vmem:[%s719_s8 + $0x8] sm:$0xff]  ;;  %295 = vmatpush.msra.mxu3 %v265_v4 }
   0xf   :  { %296 = vmatpush.msra.mxu3 %v264_v5 }
  0x77   :  { %v621_v8 = vpop.permute.xlu0 %116 }
  0x7f   :  { %v625_v11 = vpop.permute.xlu0 %118 }
  0x82   :  { %v74_v6 = vpop.f32.mrf.mxu0 }
  0x83   :  { %471 = vmatmul.msk.f32.vlgmr.msra.gmra.mxu1 %vm80_vm2, %v74_v6 }
  0x8a   :  { %v76_v7 = vpop.f32.mrf.mxu0 }
  0x8b   :  { %472 = vmatmul.msk.f32.vlgmr.msra.gmra.mxu2 %vm80_vm2, %v76_v7 }
 0x100   :  { %v108_v9 = vpop.f32.mrf.mxu1 }
 0x101   :  { %v122_v10 = vsel %vm80_vm2, %v108_v9, %v621_v8 }
 0x102   :  { %473 = vmatmul.msk.f32.vlgmr.msrb.gmra.mxu2 %vm129_vm3, %v122_v10 }
 0x10e   :  { %v111_v12 = vpop.f32.mrf.mxu2 }
 0x10f   :  { %v123_v13 = vsel %vm80_vm2, %v111_v12, %v625_v11  ;;  %v263_v12 = vld [vmem:[%s719_s8] sm:$0xff] }
 0x110   :  { %474 = vmatmul.msk.f32.gmra.mxu2 %vm129_vm3, %v123_v13  ;;  %297 = vmatpush.msra.mxu3 %v263_v12 }
 0x185   :  { %v153_v15 = vpop.f32.mrf.mxu2 }
 0x186   :  { %v154_v16 = vadd.f32 %v494_v14, %v153_v15 }
 0x188   :  { %207 = vrot.lane.b32.xlu2 %v154_v16, %s526_s6  ;;  %161 = vrot.lane.b32.xlu1 %v154_v16, %s527_s14 }
 0x193   :  { %v156_v17 = vpop.f32.mrf.mxu2 }
 0x194   :  { %v157_v18 = vadd.f32 %v494_v14, %v156_v17 }
 0x196   :  { %209 = vrot.lane.b32.xlu2 %v157_v18, %s526_s6  ;;  %163 = vrot.lane.b32.xlu1 %v157_v18, %s527_s14 }
 0x1e2   :  { %v208_v38 = vpop.permute.xlu2 %207 }
 0x1f0   :  { %v210_v50 = vpop.permute.xlu2 %209 }
 0x1fa   :  { %v162_v19 = vpop.permute.xlu1 %161 }
 0x1fb   :  { %v167_v20 = vadd.f32 %v162_v19, %v154_v16  ;;  %v495_v19 = vld [vmem:[%s720_s9] ss:$0 sm:$0xff] }
 0x1fd   :  { %v475_v21 = vmul.f32 -1.442695, %v167_v20 }
 0x1ff   :  { %497 = vpow2.f32 %v475_v21 }
 0x205   :  { %v498_v22 = vpop.eup %497 }
 0x206   :  { %v175_v23 = vadd.f32 1.0, %v498_v22 }
 0x208   :  { %499 = vrcp.f32 %v175_v23  ;;  %v164_v24 = vpop.permute.xlu1 %163  ;;  %v188_v30 = vand.u32 2147483648, %v175_v23  ;;  %v186_v33 = vand.u32 2147483647, %v175_v23  ;;  %vm182_vm5 = vweird.f32 %v175_v23 }
 0x209   :  { %v168_v25 = vadd.f32 %v164_v24, %v157_v18 }
 0x20a   :  { %v189_v36 = vor.u32 1.1754944e-38, %v188_v30  ;;  %vm187_vm7 = vcmp.eq.f32.partialorder %v186_v33, 8.507059e+37 }
 0x20b   :  { %v476_v26 = vmul.f32 -1.442695, %v168_v25 }
 0x20d   :  { %501 = vpow2.f32 %v476_v26  ;;  %v346_v26 = vld [vmem:[%s721_s4 + $0x8] sm:$0xff] }
 0x20e   :  { %v500_v27 = vpop.eup %499 }
 0x20f   :  { %v178_v28 = vmul.f32 %v500_v27, %v175_v23  ;;  %vm183_vm4 = vweird.f32 %v500_v27 }
 0x210   :  { %vm184_vm6 = vmor %vm182_vm5, %vm183_vm4  ;;  %vm405_vm5 = vcmask 261120  }
 0x211   :  { %v179_v29 = vsub.f32 1.0, %v178_v28 }
 0x213   :  { %v502_v31 = vpop.eup %501  ;;  %v180_v32 = vmul.f32 %v500_v27, %v179_v29 }
 0x214   :  { %v176_v34 = vadd.f32 1.0, %v502_v31 }
 0x215   :  { %v181_v35 = vadd.f32 %v500_v27, %v180_v32 }
 0x216   :  { %503 = vrcp.f32 %v176_v34  ;;  %v203_v44 = vand.u32 2147483648, %v176_v34  ;;  %v201_v46 = vand.u32 2147483647, %v176_v34  ;;  %vm197_vm9 = vweird.f32 %v176_v34 }
 0x217   :  { %v185_v37 = vsel %vm184_vm6, %v500_v27, %v181_v35  ;;  %vm451_vm6 = vcmask 523264  }
 0x218   :  { %v190_v39 = vsel %vm187_vm7, %v189_v36, %v185_v37  ;;  %v204_v48 = vor.u32 1.1754944e-38, %v203_v44  ;;  %vm202_vm11 = vcmp.eq.f32.partialorder %v201_v46, 8.507059e+37  ;;  %vm454_vm7 = vcmask 531456  }
 0x219   :  { %v213_v40 = vmul.f32 %v208_v38, %v190_v39  ;;  %v227_v60 = vsub.f32 1.0, %v190_v39  ;;  %v239_v62 = vmul.f32 %v190_v39, %v621_v8 }
 0x21b   :  { %217 = vrot.lane.b32.xlu0 %v213_v40, %s528_s7 }
 0x21c   :  { %v504_v41 = vpop.eup %503 }
 0x21d   :  { %v193_v42 = vmul.f32 %v504_v41, %v176_v34  ;;  %vm198_vm8 = vweird.f32 %v504_v41 }
 0x21e   :  { %vm199_vm10 = vmor %vm197_vm9, %vm198_vm8 }
 0x21f   :  { %v194_v43 = vsub.f32 1.0, %v193_v42 }
 0x221   :  { %v195_v45 = vmul.f32 %v504_v41, %v194_v43 }
 0x223   :  { %v196_v47 = vadd.f32 %v504_v41, %v195_v45 }
 0x225   :  { %v200_v49 = vsel %vm199_vm10, %v504_v41, %v196_v47 }
 0x226   :  { %v205_v51 = vsel %vm202_vm11, %v204_v48, %v200_v49 }
 0x227   :  { %v214_v52 = vmul.f32 %v210_v50, %v205_v51  ;;  %v228_v6 = vsub.f32 1.0, %v205_v51  ;;  %v240_v8 = vmul.f32 %v205_v51, %v625_v11 }
 0x229   :  { %219 = vrot.lane.b32.xlu1 %v214_v52, %s528_s7 }
 0x28d   :  { %v218_v53 = vpop.permute.xlu0 %217 }
 0x28e   :  { %v223_v54 = vadd.f32 %v218_v53, %v154_v16  ;;  %v345_v16 = vld [vmem:[%s721_s4] sm:$0xff] }
 0x290   :  { %505 = vtanh.f32 %v223_v54 }
 0x296   :  { %v506_v55 = vpop.eup %505 }
 0x297   :  { %231 = vrot.lane.b32.xlu2 %v506_v55, %s529_s15 }
 0x29b   :  { %v220_v56 = vpop.permute.xlu1 %219 }
 0x29c   :  { %v224_v57 = vadd.f32 %v220_v56, %v157_v18 }
 0x29e   :  { %507 = vtanh.f32 %v224_v57 }
 0x29f   :  { %255 = vrot.lane.b32.xlu2 %v243_v59, %s525_s0 }
 0x2a4   :  { %v508_v58 = vpop.eup %507 }
 0x2a5   :  { %233 = vrot.lane.b32.xlu0 %v508_v58, %s529_s15 }
 0x2f1   :  { %v232_v61 = vpop.permute.xlu2 %231 }
 0x2f2   :  { %v237_v63 = vmul.f32 %v232_v61, %v227_v60 }
 0x2f4   :  { %v241_v0 = vadd.f32 %v239_v62, %v237_v63 }
 0x2f6   :  { %247 = vrot.lane.b32.xlu1 %v241_v0, %s529_s15 }
 0x2f9   :  { %v256_v13 = vpop.permute.xlu2 %255 }
 0x2fe   :  { %257 = vrot.lane.b32.xlu1 %v244_v1, %s525_s0  ;;  %s530_s0 = smov 32  }
 0x306   :  { %349 = vrot.lane.b32.xlu1 %v345_v16, %s530_s0 }
 0x317   :  { %v234_v7 = vpop.permute.xlu0 %233 }
 0x318   :  { %v238_v9 = vmul.f32 %v234_v7, %v228_v6  ;;  %v394_v6 = vld [vmem:[%s722_s10 + $0x18] sm:$0xff]  ;;  %v393_v7 = vld [vmem:[%s722_s10 + $0x10] sm:$0xff] }
 0x319   :  { %422 = vmatpush.msrb.mxu1 %v394_v6 }
 0x31a   :  { %v242_v10 = vadd.f32 %v240_v8, %v238_v9  ;;  %v392_v8 = vld [vmem:[%s722_s10 + $0x8] sm:$0xff]  ;;  %v391_v9 = vld [vmem:[%s722_s10] sm:$0xff] }
 0x31b   :  { %423 = vmatpush.msrb.mxu1 %v393_v7 }
 0x31c   :  { %249 = vrot.lane.b32.xlu0 %v242_v10, %s529_s15 }
 0x31d   :  { %424 = vmatpush.msrb.mxu1 %v392_v8 }
 0x31f   :  { %425 = vmatpush.msrb.mxu1 %v391_v9 }
 0x368   :  { %v248_v14 = vpop.permute.xlu1 %247 }
 0x369   :  { %v261_v15 = vsel %vm80_vm2, %v248_v14, %v256_v13 }
 0x36a   :  { %478 = vmatmul.msk.f32.vlgmr.msra.gmra.mxu3 %vm272_vm12, %v261_v15  ;;  %v17_v15 = vstv %s723_s11 }
 0x36b   :  { %18 = vst [vmem:[#allocation2] sm:$0x1] %v17_v15 }
 0x370   :  { %v258_v11 = vpop.permute.xlu1 %257 }
 0x378   :  { %v350_v57 = vpop.permute.xlu1 %349 }
 0x38e   :  { %v250_v17 = vpop.permute.xlu0 %249 }
 0x38f   :  { %v262_v18 = vsel %vm80_vm2, %v250_v17, %v258_v11  ;;  %v496_v11 = vld [vmem:[#allocation2] ss:$0 sm:$0xff] }
 0x390   :  { %479 = vmatmul.msk.f32.gmra.mxu3 %vm272_vm12, %v262_v18 }
 0x3ed   :  { %v299_v20 = vpop.f32.mrf.mxu3 }
 0x3ee   :  { %v300_v21 = vadd.f32 %v495_v19, %v299_v20 }
 0x3f0   :  { %509 = vtanh.f32 %v300_v21  ;;  %v480_v27 = vmul.f32 -1.442695, %v300_v21 }
 0x3f6   :  { %v510_v22 = vpop.eup %509 }
 0x3f7   :  { %359 = vrot.lane.b32.xlu2 %v510_v22, %s531_s13 }
 0x413   :  { %v302_v23 = vpop.f32.mrf.mxu3 }
 0x414   :  { %v303_v24 = vadd.f32 %v495_v19, %v302_v23 }
 0x416   :  { %511 = vtanh.f32 %v303_v24  ;;  %v481_v42 = vmul.f32 -1.442695, %v303_v24 }
 0x417   :  { %513 = vpow2.f32 %v480_v27 }
 0x41c   :  { %v512_v25 = vpop.eup %511 }
 0x41d   :  { %361 = vrot.lane.b32.xlu0 %v512_v25, %s531_s13  ;;  %v514_v28 = vpop.eup %513 }
 0x41e   :  { %v311_v29 = vadd.f32 1.0, %v514_v28 }
 0x420   :  { %515 = vrcp.f32 %v311_v29  ;;  %v324_v35 = vand.u32 2147483648, %v311_v29  ;;  %vm318_vm14 = vweird.f32 %v311_v29  ;;  %v322_v36 = vand.u32 2147483647, %v311_v29 }
 0x421   :  { %517 = vpow2.f32 %v481_v42 }
 0x422   :  { %v325_v38 = vor.u32 1.1754944e-38, %v324_v35  ;;  %vm323_vm0 = vcmp.eq.f32.partialorder %v322_v36, 8.507059e+37 }
 0x425   :  { %351 = vrot.lane.b32.xlu0 %v346_v26, %s530_s0 }
 0x426   :  { %v516_v30 = vpop.eup %515 }
 0x427   :  { %v314_v31 = vmul.f32 %v516_v30, %v311_v29  ;;  %vm319_vm13 = vweird.f32 %v516_v30  ;;  %v518_v43 = vpop.eup %517 }
 0x428   :  { %vm320_vm15 = vmor %vm318_vm14, %vm319_vm13  ;;  %v312_v44 = vadd.f32 1.0, %v518_v43 }
 0x429   :  { %v315_v32 = vsub.f32 1.0, %v314_v31 }
 0x42a   :  { %519 = vrcp.f32 %v312_v44  ;;  %v339_v50 = vand.u32 2147483648, %v312_v44  ;;  %vm333_vm2 = vweird.f32 %v312_v44  ;;  %v337_v51 = vand.u32 2147483647, %v312_v44 }
 0x42b   :  { %v316_v33 = vmul.f32 %v516_v30, %v315_v32 }
 0x42c   :  { %v340_v53 = vor.u32 1.1754944e-38, %v339_v50  ;;  %vm338_vm4 = vcmp.eq.f32.partialorder %v337_v51, 8.507059e+37 }
 0x42d   :  { %v317_v34 = vadd.f32 %v516_v30, %v316_v33 }
 0x42f   :  { %v321_v37 = vsel %vm320_vm15, %v516_v30, %v317_v34 }
 0x430   :  { %v326_v39 = vsel %vm323_vm0, %v325_v38, %v321_v37  ;;  %v520_v45 = vpop.eup %519 }
 0x431   :  { %v329_v46 = vmul.f32 %v520_v45, %v312_v44  ;;  %vm334_vm1 = vweird.f32 %v520_v45  ;;  %v355_v58 = vmul.f32 %v350_v57, %v326_v39 }
 0x432   :  { %vm335_vm3 = vmor %vm333_vm2, %vm334_vm1 }
 0x433   :  { %v330_v47 = vsub.f32 1.0, %v329_v46 }
 0x435   :  { %v331_v48 = vmul.f32 %v520_v45, %v330_v47 }
 0x437   :  { %v332_v49 = vadd.f32 %v520_v45, %v331_v48 }
 0x439   :  { %v336_v52 = vsel %vm335_vm3, %v520_v45, %v332_v49 }
 0x43a   :  { %v341_v55 = vsel %vm338_vm4, %v340_v53, %v336_v52 }
 0x451   :  { %v360_v40 = vpop.permute.xlu2 %359 }
 0x452   :  { %v365_v41 = vmul.f32 %v360_v40, %v326_v39 }
 0x454   :  { %369 = vrot.lane.b32.xlu2 %v365_v41, %s530_s0 }
 0x48f   :  { %v362_v54 = vpop.permute.xlu0 %361 }
 0x490   :  { %v366_v56 = vmul.f32 %v362_v54, %v341_v55 }
 0x492   :  { %371 = vrot.lane.b32.xlu1 %v366_v56, %s530_s0 }
 0x497   :  { %v352_v62 = vpop.permute.xlu0 %351 }
 0x498   :  { %v356_v63 = vmul.f32 %v352_v62, %v341_v55 }
 0x4ae   :  { %v370_v59 = vpop.permute.xlu2 %369 }
 0x4af   :  { %v375_v60 = vadd.f32 %v370_v59, %v355_v58 }
 0x4b1   :  { %521 = vtanh.f32 %v375_v60 }
 0x4b7   :  { %v522_v61 = vpop.eup %521 }
 0x4b8   :  { %381 = vrot.lane.b32.xlu2 %v522_v61, %s531_s13 }
 0x504   :  { %v372_v0 = vpop.permute.xlu1 %371 }
 0x505   :  { %v376_v1 = vadd.f32 %v372_v0, %v356_v63 }
 0x507   :  { %523 = vtanh.f32 %v376_v1 }
 0x50d   :  { %v524_v2 = vpop.eup %523 }
 0x50e   :  { %383 = vrot.lane.b32.xlu0 %v524_v2, %s531_s13 }
 0x512   :  { %v382_v3 = vpop.permute.xlu2 %381 }
 0x513   :  { %v387_v4 = vmul.f32 %v382_v3, %v326_v39 }
 0x515   :  { %v389_v5 = vmax.f32 %v387_v4, 0.0 }
 0x516   :  { %435 = vrot.lane.b32.xlu0 %v387_v4, %s530_s0 }
 0x517   :  { %401 = vrot.lane.b32.xlu1 %v389_v5, %s530_s0 }
 0x580   :  { %v384_v10 = vpop.permute.xlu0 %383 }
 0x581   :  { %v388_v12 = vmul.f32 %v384_v10, %v341_v55 }
 0x583   :  { %v390_v13 = vmax.f32 %v388_v12, 0.0  ;;  %437 = vrot.lane.b32.xlu1 %v388_v12, %s530_s0 }
 0x585   :  { %403 = vrot.lane.b32.xlu2 %v390_v13, %s530_s0 }
 0x588   :  { %v436_v21 = vpop.permute.xlu0 %435 }
 0x589   :  { %v402_v14 = vpop.permute.xlu1 %401  ;;  %v449_v22 = vsel %vm405_vm5, %v436_v21, %v375_v60 }
 0x58a   :  { %482 = vmatmul.msk.f32.vlgmr.msrb.gmra.mxu1 %vm405_vm5, %v402_v14 }
 0x5df   :  { %v404_v16 = vpop.permute.xlu2 %403 }
 0x5e0   :  { %483 = vmatmul.msk.f32.gmra.mxu1 %vm405_vm5, %v404_v16 }
 0x5f5   :  { %v438_v25 = vpop.permute.xlu1 %437 }
 0x5f6   :  { %v450_v26 = vsel %vm405_vm5, %v438_v25, %v376_v1 }
 0x607   :  { %v427_v17 = vpop.f32.mrf.mxu1 }
 0x608   :  { %v428_v18 = vadd.f32 %v496_v11, %v427_v17 }
 0x60a   :  { %443 = vrot.lane.b32.xlu2 %v428_v18, %s531_s13 }
 0x65d   :  { %v430_v19 = vpop.f32.mrf.mxu1 }
 0x65e   :  { %v431_v20 = vadd.f32 %v496_v11, %v430_v19 }
 0x660   :  { %445 = vrot.lane.b32.xlu0 %v431_v20, %s531_s13 }
 0x664   :  { %v444_v23 = vpop.permute.xlu2 %443 }
 0x665   :  { %v452_v24 = vsel %vm451_vm6, %v449_v22, %v444_v23 }
 0x666   :  { %455 = vst.msk [vmem:[%s724_s12] sm:$0xff] %vm454_vm7, %v452_v24 }
 0x6d2   :  { %v446_v27 = vpop.permute.xlu0 %445 }
 0x6d3   :  { %v453_v28 = vsel %vm451_vm6, %v450_v26, %v446_v27 }
 0x6d4   :  { %456 = vst.msk [vmem:[%s724_s12 + $0x8] sm:$0xff] %vm454_vm7, %v453_v28 }

</bundles_post_ra>
